<compile_context>
chip_gen: v7x
topology: tpu7x:2x2x1
jax: 0.10.0
libtpu: 0.0.40
codegen_flags: <defaults>
</compile_context>

<pallas_src>
import jax
import jax.numpy as jnp
from jax.experimental import pallas as pl
from jax.experimental.pallas import tpu as pltpu

_LANES = 128  # TPU vreg lane width


def _identity_copy_kernel(x_ref, o_ref):
    # Full-tile copy: load the VMEM block and store it to the output block.
    o_ref[...] = x_ref[...]


def _vmem_capacity_bytes() -> int:
    try:
        return int(pltpu.get_tpu_info().vmem_capacity_bytes)
    except Exception:
        return 64 * 1024 * 1024  # conservative fallback: v7x per-TensorCore VMEM


def _pick_tile_rows(num_rows: int, row_bytes: int) -> int:
    """Pick a sublane-aligned tile height from the per-chip VMEM budget.

    The pipeline keeps ~4 live tiles (input + output, each double-buffered), so
    we budget each tile at vmem/64 (2 MiB on 128-MiB v5e/v6e, 1 MiB on 64-MiB
    v7x).  Total footprint <= 8 MiB fits every chip's *default* scoped-VMEM
    limit, while 1-2 MiB tiles sit at the ~85%-of-HBM-roofline operating point.
    """
    tile_budget = max(512 * 1024, _vmem_capacity_bytes() // 64)
    tb = min(num_rows, max(1, tile_budget // max(1, row_bytes)))
    if num_rows <= 8:
        return num_rows  # full extent is always a legal block
    # Block's second-to-last dim must be a multiple of 8 (or span the array).
    return max(8, (tb // 8) * 8)


def _identity_2d(x2: jax.Array) -> jax.Array:
    """Row-tiled identity copy of a lane-dense 2-D array (output aliases input)."""
    rows, cols = x2.shape
    tb = _pick_tile_rows(rows, cols * x2.dtype.itemsize)
    grid = (pl.cdiv(rows, tb),)
    return pl.pallas_call(
        _identity_copy_kernel,
        out_shape=jax.ShapeDtypeStruct((rows, cols), x2.dtype),
        grid=grid,
        in_specs=[pl.BlockSpec((tb, cols), lambda i: (i, 0))],
        out_specs=pl.BlockSpec((tb, cols), lambda i: (i, 0)),
        # Identity: reuse the input HBM buffer as the output (no new allocation).
        # NOTE: the input array passed to this pallas_call is donated.
        input_output_aliases={0: 0},
        compiler_params=pltpu.CompilerParams(
            # Multi-step batch-tile grid lets v7x's two TensorCores each take
            # tiles; harmless on single-TC v5e/v6e.
            dimension_semantics=("parallel",),
        ),
    )(x2)


def proto_dummy_net_forward(x: jax.Array) -> jax.Array:
    """Identity forward pass of ProtoDummyNet as a Pallas TPU kernel."""
    assert x.ndim == 2, "expected (batch, hidden) sentence embeddings"
    B, D = x.shape
    n = B * D

    if D % _LANES == 0:
        # Already lane-dense (real BERT hidden sizes 768 / 1024 land here):
        # run directly on x; the result aliases x's HBM buffer.
        return _identity_2d(x)

    # Narrow / odd hidden size: present a lane-dense (rows, 128) slab so the
    # store path uses full unmasked vst instead of masked partial stores.
    pad = (-n) % _LANES
    flat = x.reshape(n)
    if pad:
        flat = jnp.pad(flat, (0, pad))
    rows = (n + pad) // _LANES
    y2 = _identity_2d(flat.reshape(rows, _LANES))
    return y2.reshape(-1)[:n].reshape(B, D)


if __name__ == "__main__":
    # ProtoDummyNet has no parameters, so only the input embeddings matter.
    key = jax.random.PRNGKey(0)

    # Small BERT-embedding-like shape (narrow hidden -> lane-dense repack path).
    batch, hidden = 8, 32
    x = jax.random.normal(key, (batch, hidden), dtype=jnp.float32)
    y = jax.block_until_ready(proto_dummy_net_forward(x))
    # Compare against deterministically regenerated values (the buffer handed
    # to the kernel may be donated via input_output_aliases).
    expected = jax.random.normal(key, (batch, hidden), dtype=jnp.float32)
    assert y.shape == (batch, hidden) and y.dtype == jnp.float32
    assert bool(jnp.all(y == expected))

    # Also exercise the lane-dense direct-alias path (hidden % 128 == 0).
    key2 = jax.random.PRNGKey(0)
    x2 = jax.random.normal(key2, (4, 256), dtype=jnp.float32)
    y2 = jax.block_until_ready(proto_dummy_net_forward(x2))
    expected2 = jax.random.normal(key2, (4, 256), dtype=jnp.float32)
    assert y2.shape == (4, 256) and y2.dtype == jnp.float32
    assert bool(jnp.all(y2 == expected2))

    print("KERNEL_OK")
</pallas_src>

<mosaic_0001>
module attributes {stable_mosaic.version = 11 : i64} {
  func.func @_identity_copy_kernel(%arg0: i32, %arg1: memref<2x128xf32, #tpu.memory_space<vmem>>, %arg2: memref<2x128xf32, #tpu.memory_space<vmem>>) attributes {dimension_semantics = [#tpu.dimension_semantics<parallel>], iteration_bounds = array<i64: 1>, scalar_prefetch = 0 : i64, scratch_operands = 0 : i64, tpu.core_type = #tpu.core_type<tc>, window_params = [{transform_indices = @transform_0, window_bounds = array<i64: 2, 128>}, {transform_indices = @transform_1, window_bounds = array<i64: 2, 128>}]} {
    %c0 = arith.constant 0 : index
    %c0_0 = arith.constant 0 : index
    %0 = vector.load %arg1[%c0, %c0_0] : memref<2x128xf32, #tpu.memory_space<vmem>>, vector<2x128xf32>
    %c0_1 = arith.constant 0 : index
    %c0_2 = arith.constant 0 : index
    %1 = vector.load %arg2[%c0_1, %c0_2] : memref<2x128xf32, #tpu.memory_space<vmem>>, vector<2x128xf32>
    tpu.vector_store %arg2[%c0_1, %c0_2], %0 {strides = array<i32>} : memref<2x128xf32, #tpu.memory_space<vmem>>, vector<2x128xf32>,
    return
  }
  func.func @transform_0(%arg0: i32) -> (i32, i32) {
    %c0_i32 = arith.constant 0 : i32
    %c0_i32_0 = arith.constant 0 : i32
    return %arg0, %c0_i32 : i32, i32
  }
  func.func @transform_1(%arg0: i32) -> (i32, i32) {
    %c0_i32 = arith.constant 0 : i32
    %c0_i32_0 = arith.constant 0 : i32
    return %arg0, %c0_i32 : i32, i32
  }
}

</mosaic_0001>

<bundles_post_ra>
// kernel: tpu_custom_call.1
= control target key start
LH: loop header
LB: loop body
LE: loop exit
PB: predicated region body
PF: predicated region fallthrough
CT: control target
= control target key end

     0   :  { %6 = vsyncpa [#allocation3], 0  ;;  %s124_s0 = inlined_call_operand.hbm [shape: f32[2,128], index: 0, kind: input, shape index: {}, may-alias: {0,1}]   ;;  %s125_s1 = inlined_call_operand.hbm [shape: f32[2,128], index: 1, kind: output, shape index: {}, may-alias: {0,1}]  }
   0x1   :  { %7 = vsyncpa [#allocation4], 0  ;;  %s88_s6 = smov [#allocation2]   ;;  %s40_s10 = scalar_lea.hbm %s124_s0, 32 }
   0x2   :  { %s14_s7 = sshll.u32 %s88_s6, 4  ;;  %p41_p0 = scmp.ne.s32.totalorder %s124_s0, %s40_s10  ;;  %s15_s7 = int_to_ptr.vmem [resolvable:$true] %s14_s7 }
   0x3   :  { %p44_p1 = scmp.lt.u32.totalorder %s40_s10, %s124_s0 }
   0x5   :  { %p46_p2 = pnand %p44_p1, %p41_p0 }
   0x7   :  { %49 = shalt.err (!%p46_p2)
}
   0x8   :  { %s50_s15 = scalar_lea.vmem %s15_s7, 32  ;;  %p55_p4 = scmp.lt.s32.totalorder %s15_s7, %s15_s7 }
   0x9   :  { %p51_p3 = scmp.ne.s32.totalorder %s15_s7, %s50_s15  ;;  %p56_p5 = scmp.lt.s32.totalorder %s50_s15, %s50_s15 }
   0xb   :  { %p57_p6 = por %p56_p5, %p55_p4 }
   0xd   :  { %p58_p7 = pnand %p57_p6, %p51_p3 }
   0xf   :  { %61 = shalt.err (!%p58_p7)
}
  0x10   :  { %17 = dma.hbm_to_vmem [thread:$0]  %s124_s0, 32, %s15_s7, [#allocation3]  }
  0x11   :  { %84 = dma.done.wait [#allocation3], 32  }
  0x12   :  { %85 = vsyncadd [#allocation3], 4294967264  ;;  %s89_s18 = smov [#allocation5]   ;;  %v21_v0 = vld [vmem:[#allocation2] sm:$0x3] }
  0x13   :  { %s29_s19 = sshll.u32 %s89_s18, 4  ;;  %22 = vst [vmem:[#allocation5] sm:$0x3] %v21_v0  ;;  %s30_s19 = int_to_ptr.vmem [resolvable:$true] %s29_s19 }
  0x14   :  { %s62_s20 = scalar_lea.vmem %s30_s19, 32  ;;  %p67_p9 = scmp.lt.s32.totalorder %s30_s19, %s30_s19 }
  0x15   :  { %p63_p8 = scmp.ne.s32.totalorder %s30_s19, %s62_s20  ;;  %p68_p10 = scmp.lt.s32.totalorder %s62_s20, %s62_s20 }
  0x17   :  { %p69_p11 = por %p68_p10, %p67_p9 }
  0x19   :  { %p70_p12 = pnand %p69_p11, %p63_p8 }
  0x1b   :  { %73 = shalt.err (!%p70_p12)
}
  0x1c   :  { %s74_s23 = scalar_lea.hbm %s125_s1, 32 }
  0x1d   :  { %p75_p13 = scmp.ne.s32.totalorder %s125_s1, %s74_s23  ;;  %p78_p0 = scmp.lt.u32.totalorder %s74_s23, %s125_s1 }
  0x1f   :  { %p80_p1 = pnand %p78_p0, %p75_p13 }
  0x21   :  { %83 = shalt.err (!%p80_p1)
}
  0x22   :  { %32 = dma.vmem_to_hbm [thread:$0]  %s30_s19, 32, %s125_s1, [#allocation4]  }
  0x23   :  { %86 = dma.done.wait [#allocation4], 32  }
  0x24   :  { %87 = vsyncadd [#allocation4], 4294967264 }
  0x25   :  { %36 = vsyncpa [#allocation3], 1 }
  0x26   :  { %37 = vsyncpa [#allocation4], 1 }

</bundles_post_ra>
